<compile_context>
chip_gen: v5e
topology: v5e:2x2
jax: 0.10.0
libtpu: 0.0.40
codegen_flags: <defaults>
</compile_context>

<pallas_src>
import functools

import jax
import jax.numpy as jnp
from jax import lax
from jax.experimental import pallas as pl
from jax.experimental.pallas import tpu as pltpu

HIDDEN = 128
LANES = 128


def policy_kernel(x_ref, w1_ref, b1_ref, wh_ref, bh_ref, probs_ref, value_ref,
                  *, num_action):
    # fc1 + ReLU  (f32 accumulate on the MXU; K = num_state, unpadded)
    h = jnp.dot(x_ref[...], w1_ref[...], preferred_element_type=jnp.float32)
    h = jnp.maximum(h + b1_ref[...], 0.0)                        # (tm, 128)

    # Fused heads: lanes [0, A) = action logits, lane A = value, rest = padding.
    raw = jnp.dot(h, wh_ref[...], preferred_element_type=jnp.float32)
    raw = raw + bh_ref[...]                                      # (tm, 128)

    col = lax.broadcasted_iota(jnp.int32, raw.shape, 1)
    is_action = col < num_action

    # Softmax over the action lanes only; padded lanes carry -inf -> exp -> 0.
    logits = jnp.where(is_action, raw, -jnp.inf)
    m = jnp.max(logits, axis=-1, keepdims=True)
    e = jnp.exp(logits - m)
    denom = jnp.sum(e, axis=-1, keepdims=True)
    probs = e / denom                                            # exact normalize

    # Narrow stores: only the meaningful lanes hit HBM.
    probs_ref[...] = probs[:, :num_action]
    value_ref[...] = raw[:, num_action:num_action + 1]


def prepare_params(w1, b1, wa, ba, wv, bv):
    """Fuse the two heads into one 128-lane weight/bias ONCE (cache with params)."""
    H = w1.shape[1]
    A = wa.shape[1]
    assert H == HIDDEN and A + 1 <= LANES
    wh = (jnp.zeros((H, LANES), jnp.float32)
          .at[:, :A].set(wa.astype(jnp.float32))
          .at[:, A:A + 1].set(wv.astype(jnp.float32)))
    bh = (jnp.zeros((1, LANES), jnp.float32)
          .at[:, :A].set(jnp.asarray(ba, jnp.float32).reshape(1, A))
          .at[:, A:A + 1].set(jnp.asarray(bv, jnp.float32).reshape(1, 1)))
    return (w1.astype(jnp.float32),
            jnp.asarray(b1, jnp.float32).reshape(1, H),
            wh, bh)


def policy_forward(x, w1, b1, wh, bh, *, num_action, tm=None):
    """x: (B, S) f32.  Fused params from prepare_params().
    Returns (probs (B, num_action), value (B, 1))."""
    B, S = x.shape
    H = w1.shape[1]
    A = num_action

    # Batch tile: sublane-aligned; for large batches split into >=2 grid steps
    # (megacore) with tiles capped at 256 rows.
    if tm is None:
        if B <= 128:
            tm = max(8, pl.cdiv(B, 8) * 8)
        else:
            tm = min(256, pl.cdiv(pl.cdiv(B, 2), 8) * 8)
    grid = (pl.cdiv(B, tm),)

    kernel = functools.partial(policy_kernel, num_action=A)

    probs, value = pl.pallas_call(
        kernel,
        out_shape=(jax.ShapeDtypeStruct((B, A), jnp.float32),
                   jax.ShapeDtypeStruct((B, 1), jnp.float32)),
        grid=grid,
        in_specs=[
            pl.BlockSpec((tm, S), lambda i: (i, 0)),      # x: tiled over batch
            pl.BlockSpec((S, H), lambda i: (0, 0)),       # weights: resident
            pl.BlockSpec((1, H), lambda i: (0, 0)),
            pl.BlockSpec((H, LANES), lambda i: (0, 0)),
            pl.BlockSpec((1, LANES), lambda i: (0, 0)),
        ],
        out_specs=(
            pl.BlockSpec((tm, A), lambda i: (i, 0)),
            pl.BlockSpec((tm, 1), lambda i: (i, 0)),
        ),
        compiler_params=pltpu.CompilerParams(
            dimension_semantics=("parallel",)),
    )(x, w1, b1, wh, bh)

    return probs, value


def init_params(key, num_state, num_action, hidden=HIDDEN):
    """Deterministic synthetic init; mirrors nn.Linear shapes (stored transposed)."""
    k1, k2, k3, k4, k5, k6 = jax.random.split(key, 6)
    w1 = jax.random.normal(k1, (num_state, hidden), jnp.float32) * 0.1
    b1 = jax.random.normal(k2, (1, hidden), jnp.float32) * 0.01
    wa = jax.random.normal(k3, (hidden, num_action), jnp.float32) * 0.1
    ba = jax.random.normal(k4, (1, num_action), jnp.float32) * 0.01
    wv = jax.random.normal(k5, (hidden, 1), jnp.float32) * 0.1
    bv = jax.random.normal(k6, (1, 1), jnp.float32) * 0.01
    return w1, b1, wa, ba, wv, bv


def _reference(x, params):
    w1, b1, wa, ba, wv, bv = params
    h = jnp.maximum(x @ w1 + b1, 0.0)
    return jax.nn.softmax(h @ wa + ba, axis=-1), h @ wv + bv


if __name__ == "__main__":
    key = jax.random.PRNGKey(0)
    k_x, k_p, k_big = jax.random.split(key, 3)

    NUM_STATE, NUM_ACTION = 4, 2   # CartPole-like shapes
    raw_params = init_params(k_p, NUM_STATE, NUM_ACTION)
    fused_params = prepare_params(*raw_params)          # built once, reused per step
    fwd = jax.jit(policy_forward, static_argnames=("num_action", "tm"))

    # Small-batch check (matches the module's typical single-step use).
    B = 2
    x = jax.random.normal(k_x, (B, NUM_STATE), jnp.float32)
    probs, value = fwd(x, *fused_params, num_action=NUM_ACTION)
    jax.block_until_ready((probs, value))

    probs_ref, value_ref = _reference(x, raw_params)
    assert probs.shape == (B, NUM_ACTION) and value.shape == (B, 1)
    assert jnp.allclose(probs, probs_ref, atol=1e-5)
    assert jnp.allclose(value, value_ref, atol=1e-5)
    assert jnp.allclose(jnp.sum(probs, axis=-1), 1.0, atol=1e-5)

    # Larger batch exercises the batch-tiled grid (2 tiles, partial last block).
    BB = 300
    xb = jax.random.normal(k_big, (BB, NUM_STATE), jnp.float32)
    probs_b, value_b = fwd(xb, *fused_params, num_action=NUM_ACTION)
    jax.block_until_ready((probs_b, value_b))
    probs_bref, value_bref = _reference(xb, raw_params)
    assert probs_b.shape == (BB, NUM_ACTION) and value_b.shape == (BB, 1)
    assert jnp.allclose(probs_b, probs_bref, atol=1e-5)
    assert jnp.allclose(value_b, value_bref, atol=1e-5)
    assert jnp.allclose(jnp.sum(probs_b, axis=-1), 1.0, atol=1e-5)

    print("KERNEL_OK")
</pallas_src>

<mosaic_0001>
module attributes {stable_mosaic.version = 11 : i64} {
  func.func @policy_kernel(%arg0: i32, %arg1: memref<8x4xf32, #tpu.memory_space<vmem>>, %arg2: memref<4x128xf32, #tpu.memory_space<vmem>>, %arg3: memref<1x128xf32, #tpu.memory_space<vmem>>, %arg4: memref<128x128xf32, #tpu.memory_space<vmem>>, %arg5: memref<1x128xf32, #tpu.memory_space<vmem>>, %arg6: memref<8x2xf32, #tpu.memory_space<vmem>>, %arg7: memref<8x1xf32, #tpu.memory_space<vmem>>) attributes {dimension_semantics = [#tpu.dimension_semantics<parallel>], iteration_bounds = array<i64: 1>, scalar_prefetch = 0 : i64, scratch_operands = 0 : i64, tpu.core_type = #tpu.core_type<tc>, window_params = [{transform_indices = @transform_0, window_bounds = array<i64: 8, 4>}, {pipeline_mode = #tpu.pipeline_mode<synchronous>, transform_indices = @transform_1, window_bounds = array<i64: 4, 128>}, {pipeline_mode = #tpu.pipeline_mode<synchronous>, transform_indices = @transform_2, window_bounds = array<i64: 1, 128>}, {pipeline_mode = #tpu.pipeline_mode<synchronous>, transform_indices = @transform_3, window_bounds = array<i64: 128, 128>}, {pipeline_mode = #tpu.pipeline_mode<synchronous>, transform_indices = @transform_4, window_bounds = array<i64: 1, 128>}, {transform_indices = @transform_5, window_bounds = array<i64: 8, 2>}, {transform_indices = @transform_6, window_bounds = array<i64: 8, 1>}]} {
    %c0 = arith.constant 0 : index
    %c0_0 = arith.constant 0 : index
    %0 = vector.load %arg1[%c0, %c0_0] : memref<8x4xf32, #tpu.memory_space<vmem>>, vector<8x4xf32>
    %c0_1 = arith.constant 0 : index
    %c0_2 = arith.constant 0 : index
    %1 = vector.load %arg2[%c0_1, %c0_2] : memref<4x128xf32, #tpu.memory_space<vmem>>, vector<4x128xf32>
    %cst = arith.constant dense<0.000000e+00> : vector<8x128xf32>
    %2 = tpu.matmul %0, %1, %cst {dimension_numbers = #tpu.dot_dimension_numbers<[1], [0], [0], [1], [0, 0, 1, 1], [], []>} : vector<8x4xf32>, vector<4x128xf32>, vector<8x128xf32> -> vector<8x128xf32>
    %c0_3 = arith.constant 0 : index
    %c0_4 = arith.constant 0 : index
    %3 = vector.load %arg3[%c0_3, %c0_4] : memref<1x128xf32, #tpu.memory_space<vmem>>, vector<1x128xf32>
    %4 = vector.broadcast %3 : vector<1x128xf32> to vector<8x128xf32>
    %5 = arith.addf %2, %4 : vector<8x128xf32>
    %cst_5 = arith.constant 0.000000e+00 : f32
    %6 = vector.broadcast %cst_5 : f32 to vector<8x128xf32>
    %7 = arith.maximumf %5, %6 : vector<8x128xf32>
    %c0_6 = arith.constant 0 : index
    %c0_7 = arith.constant 0 : index
    %8 = vector.load %arg4[%c0_6, %c0_7] : memref<128x128xf32, #tpu.memory_space<vmem>>, vector<128x128xf32>
    %cst_8 = arith.constant dense<0.000000e+00> : vector<8x128xf32>
    %9 = tpu.matmul %7, %8, %cst_8 {dimension_numbers = #tpu.dot_dimension_numbers<[1], [0], [0], [1], [0, 0, 1, 1], [], []>} : vector<8x128xf32>, vector<128x128xf32>, vector<8x128xf32> -> vector<8x128xf32>
    %c0_9 = arith.constant 0 : index
    %c0_10 = arith.constant 0 : index
    %10 = vector.load %arg5[%c0_9, %c0_10] : memref<1x128xf32, #tpu.memory_space<vmem>>, vector<1x128xf32>
    %11 = vector.broadcast %10 : vector<1x128xf32> to vector<8x128xf32>
    %12 = arith.addf %9, %11 : vector<8x128xf32>
    %13 = tpu.iota {dimensions = array<i32: 1>} : vector<8x128xi32>
    %c2_i32 = arith.constant 2 : i32
    %14 = vector.broadcast %c2_i32 : i32 to vector<8x128xi32>
    %15 = arith.cmpi slt, %13, %14 : vector<8x128xi32>
    %cst_11 = arith.constant 0xFF800000 : f32
    %16 = vector.broadcast %cst_11 : f32 to vector<8x128xf32>
    %17 = arith.select %15, %12, %16 : vector<8x128xi1>, vector<8x128xf32>
    %cst_12 = arith.constant dense<0xFF800000> : vector<8xf32>
    %18 = vector.multi_reduction <maximumf>, %17, %cst_12 [1] : vector<8x128xf32> to vector<8xf32>
    %19 = vector.shape_cast %18 : vector<8xf32> to vector<8x1xf32>
    %20 = vector.broadcast %19 : vector<8x1xf32> to vector<8x128xf32>
    %21 = arith.subf %17, %20 : vector<8x128xf32>
    %22 = math.exp %21 : vector<8x128xf32>
    %cst_13 = arith.constant dense<0.000000e+00> : vector<8xf32>
    %23 = vector.multi_reduction <add>, %22, %cst_13 [1] : vector<8x128xf32> to vector<8xf32>
    %24 = vector.shape_cast %23 : vector<8xf32> to vector<8x1xf32>
    %25 = vector.broadcast %24 : vector<8x1xf32> to vector<8x128xf32>
    %26 = arith.divf %22, %25 : vector<8x128xf32>
    %27 = vector.extract_strided_slice %26 {offsets = [0, 0], sizes = [8, 2], strides = [1, 1]} : vector<8x128xf32> to vector<8x2xf32>
    %c0_14 = arith.constant 0 : index
    %c0_15 = arith.constant 0 : index
    %28 = vector.load %arg6[%c0_14, %c0_15] : memref<8x2xf32, #tpu.memory_space<vmem>>, vector<8x2xf32>
    tpu.vector_store %arg6[%c0_14, %c0_15], %27 {strides = array<i32>} : memref<8x2xf32, #tpu.memory_space<vmem>>, vector<8x2xf32>,
    %29 = vector.extract_strided_slice %12 {offsets = [0, 2], sizes = [8, 1], strides = [1, 1]} : vector<8x128xf32> to vector<8x1xf32>
    %c0_16 = arith.constant 0 : index
    %c0_17 = arith.constant 0 : index
    %30 = vector.load %arg7[%c0_16, %c0_17] : memref<8x1xf32, #tpu.memory_space<vmem>>, vector<8x1xf32>
    tpu.vector_store %arg7[%c0_16, %c0_17], %29 {strides = array<i32>} : memref<8x1xf32, #tpu.memory_space<vmem>>, vector<8x1xf32>,
    return
  }
  func.func @transform_0(%arg0: i32) -> (i32, i32) {
    %c0_i32 = arith.constant 0 : i32
    %c0_i32_0 = arith.constant 0 : i32
    return %arg0, %c0_i32 : i32, i32
  }
  func.func @transform_1(%arg0: i32) -> (i32, i32) {
    %c0_i32 = arith.constant 0 : i32
    %c0_i32_0 = arith.constant 0 : i32
    %c0_i32_1 = arith.constant 0 : i32
    return %c0_i32, %c0_i32_0 : i32, i32
  }
  func.func @transform_2(%arg0: i32) -> (i32, i32) {
    %c0_i32 = arith.constant 0 : i32
    %c0_i32_0 = arith.constant 0 : i32
    %c0_i32_1 = arith.constant 0 : i32
    return %c0_i32, %c0_i32_0 : i32, i32
  }
  func.func @transform_3(%arg0: i32) -> (i32, i32) {
    %c0_i32 = arith.constant 0 : i32
    %c0_i32_0 = arith.constant 0 : i32
    %c0_i32_1 = arith.constant 0 : i32
    return %c0_i32, %c0_i32_0 : i32, i32
  }
  func.func @transform_4(%arg0: i32) -> (i32, i32) {
    %c0_i32 = arith.constant 0 : i32
    %c0_i32_0 = arith.constant 0 : i32
    %c0_i32_1 = arith.constant 0 : i32
    return %c0_i32, %c0_i32_0 : i32, i32
  }
  func.func @transform_5(%arg0: i32) -> (i32, i32) {
    %c0_i32 = arith.constant 0 : i32
    %c0_i32_0 = arith.constant 0 : i32
    return %arg0, %c0_i32 : i32, i32
  }
  func.func @transform_6(%arg0: i32) -> (i32, i32) {
    %c0_i32 = arith.constant 0 : i32
    %c0_i32_0 = arith.constant 0 : i32
    return %arg0, %c0_i32 : i32, i32
  }
}

</mosaic_0001>

<bundles_post_ra>
// kernel: policy_forward.1
= control target key start
LH: loop header
LB: loop body
LE: loop exit
PB: predicated region body
PF: predicated region fallthrough
CT: control target
= control target key end

     0   :  { %12 = vsyncpa [#allocation3], 0  ;;  %s428_s0 = inlined_call_operand.hbm [shape: f32[2,4], index: 0, kind: input, shape index: {}]   ;;  %s429_s1 = inlined_call_operand.hbm [shape: f32[4,128], index: 1, kind: input, shape index: {}]   ;;  %s430_s2 = inlined_call_operand.vmem [shape: f32[1,128], index: 2, kind: input, shape index: {}]   ;;  %s431_s3 = inlined_call_operand.hbm [shape: f32[128,128], index: 3, kind: input, shape index: {}]   ;;  %s432_s4 = inlined_call_operand.vmem [shape: f32[1,128], index: 4, kind: input, shape index: {}]   ;;  %s433_s5 = inlined_call_operand.hbm [shape: f32[2,2], index: 5, kind: output, shape index: {0}]   ;;  %s434_s6 = inlined_call_operand.vmem [shape: f32[2,1], index: 6, kind: output, shape index: {1}]  }
   0x1   :  { %13 = vsyncpa [#allocation6], 0 }
   0x2   :  { %14 = vsyncpa [#allocation4], 0  ;;  %s33_s23 = sshll.u32 %s429_s1, 4  ;;  %s34_s23 = int_to_ptr.hbm [resolvable:$true] %s33_s23 }
   0x3   :  { %18 = vsyncadd [#allocation3], 96  ;;  %s357_s24 = smov [#allocation5]   ;;  %s19_s28 = sshll.u32 %s428_s0, 4  ;;  %s20_s28 = int_to_ptr.hbm [resolvable:$true] %s19_s28 }
   0x4   :  { %s35_s25 = sshll.u32 %s357_s24, 4  ;;  %s358_s29 = smov [#allocation2]   ;;  %s36_s25 = int_to_ptr.vmem [resolvable:$true] %s35_s25 }
   0x5   :  { %38 = dma.hbm_to_vmem [thread:$0]  %s34_s23, 64, %s36_s25, [#allocation6]  }
   0x6   :  { %s21_s30 = sshll.u32 %s358_s29, 4  ;;  %s359_s7 = smov 32   ;;  %s22_s30 = int_to_ptr.vmem [resolvable:$true] %s21_s30 }
   0x7   :  { %s360_s8 = smov 2   ;;  %s45_s10 = sshll.u32 %s431_s3, 4  ;;  %s46_s10 = int_to_ptr.hbm [resolvable:$true] %s45_s10 }
   0x8   :  { %27 = dma.hbm_to_vmem [thread:$0]  %s20_s28, 32, %s22_s30, [#allocation3], %s359_s7, %s359_s7, %s360_s8  }
   0x9   :  { %s361_s11 = smov [#allocation7]   ;;  %s362_s0 = smov 128  }
   0xa   :  { %s47_s12 = sshll.u32 %s361_s11, 4  ;;  %s363_s13 = smov 8   ;;  %s48_s12 = int_to_ptr.vmem [resolvable:$true] %s47_s12 }
   0xb   :  { %53 = dma.hbm_to_vmem [thread:$0]  %s46_s10, 2048, %s48_s12, [#allocation6], %s362_s0, %s362_s0, %s363_s13  }
   0xc   :  { %351 = dma.done.wait [#allocation3], 128  }
   0xd   :  { %352 = vsyncadd [#allocation3], 4294967168 }
   0xe   :  { %353 = dma.done.wait [#allocation6], 2112  }
   0xf   :  { %354 = vsyncadd [#allocation6], 4294965184  ;;  %vm78_vm0 = vcmask 1043456   ;;  %vm74_vm1 = vcmask 31744   ;;  %v69_v0 = vld [vmem:[#allocation5] sm:$0xf]  ;;  %v143_v22 = vlaneseq }
  0x10   :  { %v68_v1 = vld [vmem:[#allocation2] sm:$0xff]  ;;  %238 = vmatpush.msk.msra.mxu0 %vm78_vm0, %v69_v0  ;;  %v116_v4 = vld [vmem:[#allocation7 + $0x68] sm:$0xff]  ;;  %v115_v5 = vld [vmem:[#allocation7 + $0x60] sm:$0xff]  ;;  %s364_s17 = smov 126   ;;  %vm175_vm3 = vcmask 7168   ;;  %vm169_vm8 = vcmask 15360  }
  0x11   :  { %v118_v2 = vld [vmem:[#allocation7 + $0x78] sm:$0xff]  ;;  %v117_v3 = vld [vmem:[#allocation7 + $0x70] sm:$0xff]  ;;  %239 = vmatmul.msk.f32.vlgmr.msra.gmra.mxu0 %vm74_vm1, %v68_v1  ;;  %v112_v8 = vld [vmem:[#allocation7 + $0x48] sm:$0xff]  ;;  %v144_v23 = vand.u32 127, %v143_v22 }
  0x12   :  { %123 = vmatpush.msra.mxu1 %v118_v2  ;;  %v114_v6 = vld [vmem:[#allocation7 + $0x58] sm:$0xff]  ;;  %v113_v7 = vld [vmem:[#allocation7 + $0x50] sm:$0xff]  ;;  %v111_v9 = vld [vmem:[#allocation7 + $0x40] sm:$0xff] }
  0x13   :  { %v110_v10 = vld [vmem:[#allocation7 + $0x38] sm:$0xff]  ;;  %v109_v11 = vld [vmem:[#allocation7 + $0x30] sm:$0xff]  ;;  %v108_v12 = vld [vmem:[#allocation7 + $0x28] sm:$0xff]  ;;  %vm145_vm2 = vcmp.lt.s32.totalorder %v144_v23, 2 }
  0x14   :  { %124 = vmatpush.msra.mxu1 %v117_v3  ;;  %v107_v13 = vld [vmem:[#allocation7 + $0x20] sm:$0xff]  ;;  %v106_v14 = vld [vmem:[#allocation7 + $0x18] sm:$0xff]  ;;  %v105_v15 = vld [vmem:[#allocation7 + $0x10] sm:$0xff] }
  0x15   :  { %v104_v16 = vld [vmem:[#allocation7 + $0x8] sm:$0xff]  ;;  %v103_v17 = vld [vmem:[#allocation7] sm:$0xff]  ;;  %v249_v18 = vld [vmem:[%s430_s2] ss:$0 sm:$0xff] }
  0x16   :  { %125 = vmatpush.msra.mxu1 %v116_v4  ;;  %v250_v24 = vld [vmem:[%s432_s4] ss:$0 sm:$0xff] }
  0x18   :  { %126 = vmatpush.msra.mxu1 %v115_v5 }
  0x1a   :  { %127 = vmatpush.msra.mxu1 %v114_v6 }
  0x1c   :  { %128 = vmatpush.msra.mxu1 %v113_v7 }
  0x1e   :  { %129 = vmatpush.msra.mxu1 %v112_v8 }
  0x20   :  { %130 = vmatpush.msra.mxu1 %v111_v9 }
  0x22   :  { %131 = vmatpush.msra.mxu1 %v110_v10 }
  0x24   :  { %132 = vmatpush.msra.mxu1 %v109_v11 }
  0x26   :  { %133 = vmatpush.msra.mxu1 %v108_v12 }
  0x28   :  { %134 = vmatpush.msra.mxu1 %v107_v13 }
  0x2a   :  { %135 = vmatpush.msra.mxu1 %v106_v14 }
  0x2c   :  { %136 = vmatpush.msra.mxu1 %v105_v15 }
  0x2e   :  { %137 = vmatpush.msra.mxu1 %v104_v16 }
  0x30   :  { %138 = vmatpush.msra.mxu1 %v103_v17 }
  0x8e   :  { %v99_v19 = vpop.f32.mrf.mxu0 }
  0x8f   :  { %v100_v20 = vadd.f32 %v249_v18, %v99_v19 }
  0x91   :  { %v102_v21 = vmax.f32 %v100_v20, 0.0 }
  0x93   :  { %139 = vmatmul.f32.vlgmr.msra.gmra.mxu1 %v102_v21 }
 0x110   :  { %v140_v25 = vpop.f32.mrf.mxu1 }
 0x111   :  { %v141_v26 = vadd.f32 %v250_v24, %v140_v25 }
 0x113   :  { %172 = vrot.lane.b32.xlu1 %v141_v26, %s364_s17  ;;  %v146_v27 = vsel %vm145_vm2, %v141_v26, -inf }
 0x114   :  { %147 = vmax.xlane.f32.xlu0 %v146_v27 }
 0x185   :  { %v173_v28 = vpop.permute.xlu1 %172 }
 0x186   :  { %176 = vst.msk [vmem:[#allocation9] sm:$0xff] %vm175_vm3, %v173_v28 }
 0x187   :  { %v148_v29 = vpop.xlane.xlu0 %147 }
 0x188   :  { %v149_v30 = vsub.f32 %v146_v27, %v148_v29 }
 0x18a   :  { %v150_v31 = vmul.f32 1.442695, %v149_v30 }
 0x18c   :  { %251 = vpow2.f32 %v150_v31 }
 0x192   :  { %v252_v32 = vpop.eup %251 }
 0x193   :  { %152 = vadd.xlane.f32.xlu0 %v252_v32 }
 0x206   :  { %v153_v33 = vpop.xlane.xlu0 %152 }
 0x207   :  { %253 = vrcp.f32 %v153_v33  ;;  %v165_v37 = vand.u32 2147483648, %v153_v33  ;;  %v163_v39 = vand.u32 2147483647, %v153_v33  ;;  %vm159_vm5 = vweird.f32 %v153_v33 }
 0x209   :  { %v166_v41 = vor.u32 1.1754944e-38, %v165_v37  ;;  %vm164_vm7 = vcmp.eq.f32.partialorder %v163_v39, 8.507059e+37 }
 0x20d   :  { %v254_v34 = vpop.eup %253 }
 0x20e   :  { %v155_v35 = vmul.f32 %v254_v34, %v153_v33  ;;  %vm160_vm4 = vweird.f32 %v254_v34 }
 0x20f   :  { %vm161_vm6 = vmor %vm159_vm5, %vm160_vm4 }
 0x210   :  { %v156_v36 = vsub.f32 1.0, %v155_v35 }
 0x212   :  { %v157_v38 = vmul.f32 %v254_v34, %v156_v36 }
 0x214   :  { %v158_v40 = vadd.f32 %v254_v34, %v157_v38 }
 0x216   :  { %v162_v42 = vsel %vm161_vm6, %v254_v34, %v158_v40 }
 0x217   :  { %v167_v43 = vsel %vm164_vm7, %v166_v41, %v162_v42 }
 0x218   :  { %v168_v44 = vmul.f32 %v252_v32, %v167_v43 }
 0x21a   :  { %170 = vst.msk [vmem:[#allocation8] sm:$0xff] %vm169_vm8, %v168_v44 }
 0x21b   :  { %180 = vsyncadd [#allocation4], 96  ;;  %s183_s18 = sshll.u32 %s433_s5, 4  ;;  %v208_v45 = vld [vmem:[#allocation9] sm:$0x3]  ;;  %s365_s19 = smov [#allocation8]   ;;  %s184_s18 = int_to_ptr.hbm [resolvable:$true] %s183_s18 }
 0x21c   :  { %s181_s20 = sshll.u32 %s365_s19, 4  ;;  %209 = vst [vmem:[%s434_s6] sm:$0x3] %v208_v45  ;;  %s182_s20 = int_to_ptr.vmem [resolvable:$true] %s181_s20 }
 0x21d   :  { %189 = dma.vmem_to_hbm [thread:$0]  %s182_s20, 32, %s184_s18, [#allocation4], %s359_s7, %s359_s7, %s360_s8  }
 0x21e   :  { %355 = dma.done.wait [#allocation4], 128  }
 0x21f   :  { %356 = vsyncadd [#allocation4], 4294967168 }
 0x220   :  { %231 = vsyncpa [#allocation3], 1 }
 0x221   :  { %232 = vsyncpa [#allocation6], 1 }
 0x222   :  { %233 = vsyncpa [#allocation4], 1 }

</bundles_post_ra>
